<compile_context>
chip_gen: v7x
topology: tpu7x:2x2x1
jax: 0.10.0
libtpu: 0.0.40
codegen_flags: <defaults>
</compile_context>

<pallas_src>
import math
import jax
import jax.numpy as jnp
from jax.experimental import pallas as pl
from jax.experimental.pallas import tpu as pltpu


def _round_up(x, m):
    return (x + m - 1) // m * m


def pack_pzd_params(w1, gamma, beta, w21, b21, w22, b22):
    """Pack all pzd parameters into one padded f32 slab.

    Call ONCE at parameter-initialization time; reuse the slab every forward.
    Weights are stored as (in_features, out_features), i.e. the transpose of
    PyTorch's (out, in) layout, so the kernel computes `x @ W` directly.
    """
    d_dim, zd_dim = w1.shape
    two_zd = 2 * zd_dim
    d_rows = _round_up(d_dim, 8)

    w1_pad = jnp.zeros((d_rows, two_zd), jnp.float32).at[:d_dim, :zd_dim].set(w1)
    wcat_pad = (jnp.zeros((two_zd, two_zd), jnp.float32)
                .at[:zd_dim, :zd_dim].set(w21)
                .at[:zd_dim, zd_dim:].set(w22))
    prows = (jnp.zeros((8, two_zd), jnp.float32)
             .at[0, :zd_dim].set(gamma.reshape(-1))
             .at[1, :zd_dim].set(beta.reshape(-1))
             .at[2, :zd_dim].set(b21.reshape(-1))
             .at[2, zd_dim:].set(b22.reshape(-1)))
    return jnp.concatenate([w1_pad, wcat_pad, prows], axis=0)


def pzd_kernel(d_ref, slab_ref, loc_ref, scale_ref):
    B, d_dim = d_ref.shape
    zd_dim = loc_ref.shape[1]
    two_zd = 2 * zd_dim
    d_rows = _round_up(d_dim, 8)
    p0 = d_rows + two_zd

    # Static views into the single packed slab (read each exactly once).
    w1p = slab_ref[0:d_dim, :]               # (d_dim, 2*zd): W1 | zeros
    wcatp = slab_ref[d_rows:p0, :]           # (2*zd, 2*zd): [W21|W22] over zeros
    gamma = slab_ref[p0:p0 + 1, :]           # (1, 2*zd): gamma | zeros
    beta = slab_ref[p0 + 1:p0 + 2, :]        # (1, 2*zd): beta  | zeros
    bcat = slab_ref[p0 + 2:p0 + 3, :]        # (1, 2*zd): b21   | b22

    d = d_ref[...].astype(jnp.float32)

    # fc1: Linear(d_dim -> zd_dim, bias=False), computed lane-padded to 2*zd
    # width; the padded columns stay exactly zero through BN/ReLU and the
    # zero rows of wcatp, so the final result is unaffected.
    h = jnp.dot(d, w1p, preferred_element_type=jnp.float32)

    # BatchNorm1d, training mode: batch mean, biased variance, eps=1e-5.
    mean = jnp.mean(h, axis=0, keepdims=True)
    hc = h - mean
    var = jnp.mean(hc * hc, axis=0, keepdims=True)
    s_row = jax.lax.rsqrt(var + 1e-5) * gamma       # precombined per-feature scale
    hidden = jnp.maximum(hc * s_row + beta, 0.0)    # affine + ReLU

    # Fused heads: ONE MXU pass over [W21 | W22], one lane-dense add of [b21|b22].
    z = jnp.dot(hidden, wcatp, preferred_element_type=jnp.float32) + bcat

    # Split into the two kernel outputs (no post-call XLA slices needed).
    loc_ref[...] = z[:, :zd_dim]

    sraw = z[:, zd_dim:]
    # Softplus with PyTorch semantics (threshold=20) + 1e-7.
    scale_ref[...] = jnp.where(
        sraw > 20.0, sraw, jnp.log1p(jnp.exp(jnp.minimum(sraw, 20.0)))) + 1e-7


def pzd_forward(d, slab):
    B, d_dim = d.shape
    two_zd = slab.shape[1]
    zd_dim = two_zd // 2

    flops = 2 * B * (d_dim * zd_dim + zd_dim * two_zd)
    bytes_accessed = 4 * (d.size + slab.size + 2 * B * zd_dim)
    cost = pl.CostEstimate(flops=flops,
                           transcendentals=B * zd_dim,
                           bytes_accessed=bytes_accessed)

    vmem = lambda: pl.BlockSpec(memory_space=pltpu.VMEM)
    zd_loc, zd_scale = pl.pallas_call(
        pzd_kernel,
        out_shape=(jax.ShapeDtypeStruct((B, zd_dim), jnp.float32),
                   jax.ShapeDtypeStruct((B, zd_dim), jnp.float32)),
        in_specs=[vmem(), vmem()],
        out_specs=(vmem(), vmem()),
        cost_estimate=cost,
    )(d, slab)
    return zd_loc, zd_scale


def xavier_uniform(key, fan_in, fan_out):
    # Matches torch.nn.init.xavier_uniform_ bound; stored as (fan_in, fan_out),
    # i.e. the transpose of PyTorch's (out, in) weight layout.
    bound = math.sqrt(6.0 / (fan_in + fan_out))
    return jax.random.uniform(key, (fan_in, fan_out), jnp.float32, -bound, bound)


if __name__ == "__main__":
    # Small shapes consistent with the module: d_dim=16, zd_dim=32, batch=8.
    d_dim, zd_dim, B = 16, 32, 8

    key = jax.random.PRNGKey(0)
    k_d, k_w1, k_w21, k_w22 = jax.random.split(key, 4)

    d = jax.random.normal(k_d, (B, d_dim), jnp.float32)

    w1 = xavier_uniform(k_w1, d_dim, zd_dim)        # fc1 Linear (no bias)
    gamma = jnp.ones((zd_dim,), jnp.float32)        # BatchNorm1d weight (fresh init)
    beta = jnp.zeros((zd_dim,), jnp.float32)        # BatchNorm1d bias
    w21 = xavier_uniform(k_w21, zd_dim, zd_dim)     # fc21 Linear
    b21 = jnp.zeros((zd_dim,), jnp.float32)         # fc21 bias (zeroed in __init__)
    w22 = xavier_uniform(k_w22, zd_dim, zd_dim)     # fc22 Linear
    b22 = jnp.zeros((zd_dim,), jnp.float32)         # fc22 bias (zeroed in __init__)

    # One-time parameter packing (hoisted out of the per-call path).
    slab = jax.block_until_ready(
        pack_pzd_params(w1, gamma, beta, w21, b21, w22, b22))

    fwd = jax.jit(pzd_forward)
    zd_loc, zd_scale = fwd(d, slab)
    jax.block_until_ready((zd_loc, zd_scale))

    # Sanity check against a pure-JAX reference of the PyTorch forward.
    h = d @ w1
    m = h.mean(0, keepdims=True)
    v = ((h - m) ** 2).mean(0, keepdims=True)
    hid = jnp.maximum((h - m) * jax.lax.rsqrt(v + 1e-5) * gamma + beta, 0.0)
    ref_loc = hid @ w21 + b21
    s = hid @ w22 + b22
    ref_scale = jnp.where(s > 20.0, s, jnp.log1p(jnp.exp(jnp.minimum(s, 20.0)))) + 1e-7
    assert jnp.allclose(zd_loc, ref_loc, atol=1e-5, rtol=1e-5)
    assert jnp.allclose(zd_scale, ref_scale, atol=1e-5, rtol=1e-5)
    assert float(zd_scale.min()) > 0.0

    print("KERNEL_OK")
</pallas_src>

<mosaic_0001>
module attributes {stable_mosaic.version = 11 : i64} {
  func.func @pzd_kernel(%arg0: memref<8x16xf32, #tpu.memory_space<vmem>>, %arg1: memref<88x64xf32, #tpu.memory_space<vmem>>, %arg2: memref<8x32xf32, #tpu.memory_space<vmem>>, %arg3: memref<8x32xf32, #tpu.memory_space<vmem>>) attributes {dimension_semantics = [], scalar_prefetch = 0 : i64, scratch_operands = 0 : i64, tpu.core_type = #tpu.core_type<tc>} {
    %c0 = arith.constant 0 : index
    %c0_0 = arith.constant 0 : index
    %0 = vector.load %arg1[%c0, %c0_0] : memref<88x64xf32, #tpu.memory_space<vmem>>, vector<16x64xf32>
    %c16 = arith.constant 16 : index
    %c0_1 = arith.constant 0 : index
    %1 = vector.load %arg1[%c16, %c0_1] : memref<88x64xf32, #tpu.memory_space<vmem>>, vector<64x64xf32>
    %c80 = arith.constant 80 : index
    %c0_2 = arith.constant 0 : index
    %2 = vector.load %arg1[%c80, %c0_2] : memref<88x64xf32, #tpu.memory_space<vmem>>, vector<1x64xf32>
    %c81 = arith.constant 81 : index
    %c0_3 = arith.constant 0 : index
    %3 = vector.load %arg1[%c81, %c0_3] : memref<88x64xf32, #tpu.memory_space<vmem>>, vector<1x64xf32>
    %c82 = arith.constant 82 : index
    %c0_4 = arith.constant 0 : index
    %4 = vector.load %arg1[%c82, %c0_4] : memref<88x64xf32, #tpu.memory_space<vmem>>, vector<1x64xf32>
    %c0_5 = arith.constant 0 : index
    %c0_6 = arith.constant 0 : index
    %5 = vector.load %arg0[%c0_5, %c0_6] : memref<8x16xf32, #tpu.memory_space<vmem>>, vector<8x16xf32>
    %cst = arith.constant dense<0.000000e+00> : vector<8x64xf32>
    %6 = tpu.matmul %5, %0, %cst {dimension_numbers = #tpu.dot_dimension_numbers<[1], [0], [0], [1], [0, 0, 1, 1], [], []>} : vector<8x16xf32>, vector<16x64xf32>, vector<8x64xf32> -> vector<8x64xf32>
    %cst_7 = arith.constant dense<0.000000e+00> : vector<64xf32>
    %7 = vector.multi_reduction <add>, %6, %cst_7 [0] : vector<8x64xf32> to vector<64xf32>
    %8 = vector.shape_cast %7 : vector<64xf32> to vector<1x64xf32>
    %cst_8 = arith.constant 8.000000e+00 : f32
    %9 = vector.broadcast %cst_8 : f32 to vector<1x64xf32>
    %10 = arith.divf %8, %9 : vector<1x64xf32>
    %11 = vector.broadcast %10 : vector<1x64xf32> to vector<8x64xf32>
    %12 = arith.subf %6, %11 : vector<8x64xf32>
    %13 = arith.mulf %12, %12 : vector<8x64xf32>
    %cst_9 = arith.constant dense<0.000000e+00> : vector<64xf32>
    %14 = vector.multi_reduction <add>, %13, %cst_9 [0] : vector<8x64xf32> to vector<64xf32>
    %15 = vector.shape_cast %14 : vector<64xf32> to vector<1x64xf32>
    %cst_10 = arith.constant 8.000000e+00 : f32
    %16 = vector.broadcast %cst_10 : f32 to vector<1x64xf32>
    %17 = arith.divf %15, %16 : vector<1x64xf32>
    %cst_11 = arith.constant 9.99999974E-6 : f32
    %18 = vector.broadcast %cst_11 : f32 to vector<1x64xf32>
    %19 = arith.addf %17, %18 : vector<1x64xf32>
    %20 = math.rsqrt %19 : vector<1x64xf32>
    %21 = arith.mulf %20, %2 : vector<1x64xf32>
    %22 = vector.broadcast %21 : vector<1x64xf32> to vector<8x64xf32>
    %23 = arith.mulf %12, %22 : vector<8x64xf32>
    %24 = vector.broadcast %3 : vector<1x64xf32> to vector<8x64xf32>
    %25 = arith.addf %23, %24 : vector<8x64xf32>
    %cst_12 = arith.constant 0.000000e+00 : f32
    %26 = vector.broadcast %cst_12 : f32 to vector<8x64xf32>
    %27 = arith.maximumf %25, %26 : vector<8x64xf32>
    %cst_13 = arith.constant dense<0.000000e+00> : vector<8x64xf32>
    %28 = tpu.matmul %27, %1, %cst_13 {dimension_numbers = #tpu.dot_dimension_numbers<[1], [0], [0], [1], [0, 0, 1, 1], [], []>} : vector<8x64xf32>, vector<64x64xf32>, vector<8x64xf32> -> vector<8x64xf32>
    %29 = vector.broadcast %4 : vector<1x64xf32> to vector<8x64xf32>
    %30 = arith.addf %28, %29 : vector<8x64xf32>
    %31 = vector.extract_strided_slice %30 {offsets = [0, 0], sizes = [8, 32], strides = [1, 1]} : vector<8x64xf32> to vector<8x32xf32>
    %c0_14 = arith.constant 0 : index
    %c0_15 = arith.constant 0 : index
    %32 = vector.load %arg2[%c0_14, %c0_15] : memref<8x32xf32, #tpu.memory_space<vmem>>, vector<8x32xf32>
    tpu.vector_store %arg2[%c0_14, %c0_15], %31 {strides = array<i32>} : memref<8x32xf32, #tpu.memory_space<vmem>>, vector<8x32xf32>,
    %33 = vector.extract_strided_slice %30 {offsets = [0, 32], sizes = [8, 32], strides = [1, 1]} : vector<8x64xf32> to vector<8x32xf32>
    %cst_16 = arith.constant 2.000000e+01 : f32
    %34 = vector.broadcast %cst_16 : f32 to vector<8x32xf32>
    %35 = arith.cmpf ogt, %33, %34 : vector<8x32xf32>
    %cst_17 = arith.constant 2.000000e+01 : f32
    %36 = vector.broadcast %cst_17 : f32 to vector<8x32xf32>
    %37 = arith.minimumf %33, %36 : vector<8x32xf32>
    %38 = math.exp %37 : vector<8x32xf32>
    %39 = math.log1p %38 : vector<8x32xf32>
    %40 = arith.select %35, %33, %39 : vector<8x32xi1>, vector<8x32xf32>
    %cst_18 = arith.constant 1.000000e-07 : f32
    %41 = vector.broadcast %cst_18 : f32 to vector<8x32xf32>
    %42 = arith.addf %40, %41 : vector<8x32xf32>
    %c0_19 = arith.constant 0 : index
    %c0_20 = arith.constant 0 : index
    %43 = vector.load %arg3[%c0_19, %c0_20] : memref<8x32xf32, #tpu.memory_space<vmem>>, vector<8x32xf32>
    tpu.vector_store %arg3[%c0_19, %c0_20], %42 {strides = array<i32>} : memref<8x32xf32, #tpu.memory_space<vmem>>, vector<8x32xf32>,
    return
  }
}

</mosaic_0001>

<bundles_post_ra>
// kernel: pzd_forward.1
= control target key start
LH: loop header
LB: loop body
LE: loop exit
PB: predicated region body
PF: predicated region fallthrough
CT: control target
= control target key end

     0   :  { %9 = vsyncpa [#allocation3], 0  ;;  %v381_v2 = vmov 0.0|0.0   ;;  %vm382_vm0 = vmmov 0   ;;  %v383_v4 = vmov 0.0   ;;  %s478_s0 = inlined_call_operand.vmem [shape: f32[8,16], index: 0, kind: input, shape index: {}]   ;;  %s479_s1 = inlined_call_operand.vmem [shape: f32[88,64], index: 1, kind: input, shape index: {}]   ;;  %s480_s2 = inlined_call_operand.hbm [shape: f32[8,32], index: 2, kind: output, shape index: {0}]   ;;  %s481_s3 = inlined_call_operand.hbm [shape: f32[8,32], index: 3, kind: output, shape index: {1}]  }
   0x1   :  { %v15_v0 = vld [vmem:[%s479_s1] sm:$0xff]  ;;  %v16_v1 = vld [vmem:[%s479_s1 + $0x8] sm:$0xff]  ;;  %306 = vmatprep.subr.bf16.mxu0 %v381_v2  ;;  %284 = vmatprep.mubr.msk.f32.mxu0 %vm382_vm0, %v383_v4 }
   0x2   :  { %v307_v3 = vpack.c.bf16 %v16_v1, %v15_v0  ;;  %309 = vmatprep.subr.bf16.mxu1 %v381_v2  ;;  %303 = vmatprep.mubr.msk.f32.mxu1 %vm382_vm0, %v383_v4 }
   0x3   :  { %10 = vsyncpa [#allocation5], 0  ;;  %v28_v5 = vld [vmem:[%s478_s0] sm:$0xff]  ;;  %vm29_vm1 = vcmask 130048   ;;  %v17_v6 = vld [vmem:[%s479_s1 + $0x10] sm:$0xff]  ;;  %vm103_vm2 = vcmask 523264   ;;  %v126_v39 = vlaneseq }
   0x4   :  { %308 = vmatpush3.bf16.msra.mxu0 %v307_v3  ;;  %v18_v7 = vld [vmem:[%s479_s1 + $0x18] sm:$0xff]  ;;  %v19_v9 = vld [vmem:[%s479_s1 + $0x20] sm:$0xff]  ;;  %v20_v10 = vld [vmem:[%s479_s1 + $0x28] sm:$0xff]  ;;  %vm214_vm3 = vcmask 261120   ;;  %s384_s12 = smov [#allocation2]  }
   0x5   :  { %v310_v8 = vpack.c.bf16 %v18_v7, %v17_v6  ;;  %v313_v11 = vpack.c.bf16 %v20_v10, %v19_v9  ;;  %v21_v12 = vld [vmem:[%s479_s1 + $0x30] sm:$0xff]  ;;  %v22_v13 = vld [vmem:[%s479_s1 + $0x38] sm:$0xff]  ;;  %v23_v15 = vld [vmem:[%s479_s1 + $0x40] sm:$0xff]  ;;  %v127_v40 = vshrl.u32 %v126_v39, 7  ;;  %s242_s13 = sshll.u32 %s384_s12, 4  ;;  %s243_s13 = int_to_ptr.vmem [resolvable:$true] %s242_s13 }
   0x6   :  { %v316_v14 = vpack.c.bf16 %v22_v13, %v21_v12  ;;  %v24_v16 = vld [vmem:[%s479_s1 + $0x48] sm:$0xff]  ;;  %v25_v41 = vld [vmem:[%s479_s1 + $0x50] sm:$0x1]  ;;  %v265_v46 = vld [vmem:[%s479_s1 + $0x51] ss:$0 sm:$0xff]  ;;  %s333_s14 = scalar_lea.vmem %s243_s13, 128  ;;  %p338_p1 = scmp.lt.s32.totalorder %s243_s13, %s243_s13 }
   0x7   :  { %285 = vmatmul.mubr.msk.f32.vlgmr.msra.gmra.mrb[0].mxu0 %vm29_vm1, %v28_v5  ;;  %311 = vmatpush3.bf16.msra.mxu1 %v310_v8  ;;  %v319_v17 = vpack.c.bf16 %v24_v16, %v23_v15  ;;  %v128_v42 = vsub.s32 0, %v127_v40  ;;  %v266_v50 = vld [vmem:[%s479_s1 + $0x52] ss:$0 sm:$0xff]  ;;  %p334_p0 = scmp.ne.s32.totalorder %s243_s13, %s333_s14  ;;  %p339_p2 = scmp.lt.s32.totalorder %s333_s14, %s333_s14 }
   0x8   :  { %312 = vmatprep.subr.bf16.mxu1 %v381_v2 }
   0x9   :  { %p340_p3 = por %p339_p2, %p338_p1 }
   0xb   :  { %314 = vmatpush3.bf16.msra.mxu1 %v313_v11  ;;  %p341_p4 = pnand %p340_p3, %p334_p0 }
   0xc   :  { %315 = vmatprep.subr.bf16.mxu1 %v381_v2 }
   0xf   :  { %317 = vmatpush3.bf16.msra.mxu1 %v316_v14 }
  0x10   :  { %318 = vmatprep.subr.bf16.mxu1 %v381_v2 }
  0x13   :  { %320 = vmatpush3.bf16.msra.mxu1 %v319_v17 }
  0xda   :  { %v99_v18 = vpop.f32.mrb[0].mxu0 }
  0xdb   :  { %v104_v19 = vsel %vm103_vm2, %v99_v18, 0.0  ;;  %v286_v20 = vpop.f32.mrb[1].mxu0 }
  0xdc   :  { %v105_v21 = vrot.slane %v104_v19, 4 }
  0xde   :  { %v106_v22 = vadd.f32 %v105_v21, %v104_v19 }
  0xe0   :  { %v107_v23 = vrot.slane %v106_v22, 2 }
  0xe2   :  { %v108_v24 = vadd.f32 %v107_v23, %v106_v22 }
  0xe4   :  { %v109_v25 = vrot.slane %v108_v24, 1 }
  0xe6   :  { %v110_v26 = vadd.f32 %v109_v25, %v108_v24 }
  0xe8   :  { %v112_v27 = vmul.f32 0.125, %v110_v26 }
  0xea   :  { %v113_v28 = vsub.f32 %v99_v18, %v112_v27 }
  0xec   :  { %v114_v29 = vmul.f32 %v113_v28, %v113_v28 }
  0xee   :  { %v115_v30 = vsel %vm103_vm2, %v114_v29, 0.0 }
  0xef   :  { %v116_v31 = vrot.slane %v115_v30, 4 }
  0xf1   :  { %v117_v32 = vadd.f32 %v116_v31, %v115_v30 }
  0xf3   :  { %v118_v33 = vrot.slane %v117_v32, 2 }
  0xf5   :  { %v119_v34 = vadd.f32 %v118_v33, %v117_v32 }
  0xf7   :  { %v120_v35 = vrot.slane %v119_v34, 1 }
  0xf9   :  { %v121_v36 = vadd.f32 %v120_v35, %v119_v34 }
  0xfb   :  { %v122_v37 = vmul.f32 0.125, %v121_v36 }
  0xfd   :  { %v123_v38 = vadd.f32 1e-05, %v122_v37 }
  0xff   :  { %327 = vrsqrt.f32 %v123_v38 }
 0x109   :  { %v328_v43 = vpop.eup %327 }
 0x10a   :  { %v125_v44 = vmul.f32 %v328_v43, %v25_v41 }
 0x10c   :  { %v129_v45 = vrot.slane %v125_v44, %v128_v42 }
 0x10e   :  { %v130_v47 = vmul.f32 %v129_v45, %v113_v28 }
 0x110   :  { %v135_v48 = vadd.f32 %v265_v46, %v130_v47 }
 0x112   :  { %v136_v49 = vmax.f32 %v135_v48, 0.0 }
 0x114   :  { %304 = vmatmul.mubr.msk.f32.vlgmr.msra.gmra.mrb[0].mxu1 %vm103_vm2, %v136_v49 }
 0x1e7   :  { %v210_v51 = vpop.f32.mrb[0].mxu1 }
 0x1e8   :  { %v211_v52 = vadd.f32 %v266_v50, %v210_v51  ;;  %v305_v53 = vpop.f32.mrb[1].mxu1 }
 0x1ea   :  { %v217_v54 = vmin.f32 %v211_v52, 20.0  ;;  %215 = vst.msk [vmem:[#allocation2] sm:$0xff] %vm214_vm3, %v211_v52 }
 0x1ec   :  { %v218_v55 = vmul.f32 1.442695, %v217_v54 }
 0x1ee   :  { %329 = vpow2.f32 %v218_v55 }
 0x1f8   :  { %v330_v56 = vpop.eup %329 }
 0x1f9   :  { %v220_v57 = vadd.f32 1.0, %v330_v56  ;;  %v223_v58 = vmul.f32 -0.5, %v330_v56 }
 0x1fb   :  { %331 = vlog2.f32 %v220_v57 }
 0x1fc   :  { %344 = shalt.err (!%p341_p4)
}
 0x1fd   :  { %s345_s16 = scalar_lea.hbm %s480_s2, 128 }
 0x1fe   :  { %p346_p5 = scmp.ne.s32.totalorder %s480_s2, %s345_s16  ;;  %p349_p6 = scmp.lt.u32.totalorder %s345_s16, %s480_s2 }
 0x200   :  { %p351_p7 = pnand %p349_p6, %p346_p5 }
 0x202   :  { %354 = shalt.err (!%p351_p7)
}
 0x203   :  { %245 = dma.vmem_to_hbm [thread:$0]  %s243_s13, 128, %s480_s2, [#allocation3]   ;;  %v224_v59 = vadd.f32 1.0, %v223_v58  ;;  %v226_v60 = vand.u32 2147483647, %v330_v56  ;;  %vm216_vm5 = vcmp.gt.f32.partialorder %v211_v52, 20.0 }
 0x204   :  { %s385_s23 = smov 96   ;;  %s386_s24 = smov [#allocation4]  }
 0x205   :  { %v332_v61 = vpop.eup %331  ;;  %v225_v63 = vmul.f32 %v330_v56, %v224_v59  ;;  %vm227_vm4 = vcmp.lt.f32.partialorder %v226_v60, 0.0004427343  ;;  %s252_s25 = sshll.u32 %s386_s24, 4  ;;  %s253_s25 = int_to_ptr.vmem [resolvable:$true] %s252_s25 }
 0x206   :  { %v222_v62 = vmul.f32 0.6931472, %v332_v61  ;;  %s355_s0 = scalar_lea.vmem %s253_s25, 128  ;;  %p360_p9 = scmp.lt.s32.totalorder %s253_s25, %s253_s25 }
 0x207   :  { %p356_p8 = scmp.ne.s32.totalorder %s253_s25, %s355_s0  ;;  %p361_p10 = scmp.lt.s32.totalorder %s355_s0, %s355_s0 }
 0x208   :  { %v228_v0 = vsel %vm227_vm4, %v225_v63, %v222_v62 }
 0x209   :  { %v229_v1 = vsel %vm216_vm5, %v211_v52, %v228_v0  ;;  %p362_p11 = por %p361_p10, %p360_p9 }
 0x20a   :  { %v230_v2 = vadd.f32 1e-07, %v229_v1 }
 0x20b   :  { %p363_p12 = pnand %p362_p11, %p356_p8 }
 0x20c   :  { %232 = vrot.lane.b32.xlu0 %v230_v2, %s385_s23 }
 0x27e   :  { %v233_v3 = vpop.permute.xlu0 %232 }
 0x27f   :  { %235 = vst.msk [vmem:[#allocation4] sm:$0xff] %vm214_vm3, %v233_v3 }
 0x280   :  { %366 = shalt.err (!%p363_p12)
}
 0x281   :  { %s367_s27 = scalar_lea.hbm %s481_s3, 128 }
 0x282   :  { %p368_p13 = scmp.ne.s32.totalorder %s481_s3, %s367_s27  ;;  %p371_p0 = scmp.lt.u32.totalorder %s367_s27, %s481_s3 }
 0x284   :  { %p373_p1 = pnand %p371_p0, %p368_p13 }
 0x286   :  { %376 = shalt.err (!%p373_p1)
}
 0x287   :  { %255 = dma.vmem_to_hbm [thread:$0]  %s253_s25, 128, %s481_s3, [#allocation5]  }
 0x288   :  { %377 = dma.done.wait [#allocation3], 128  }
 0x289   :  { %378 = vsyncadd [#allocation3], 4294967168 }
 0x28a   :  { %379 = dma.done.wait [#allocation5], 128  }
 0x28b   :  { %380 = vsyncadd [#allocation5], 4294967168 }
 0x28c   :  { %262 = vsyncpa [#allocation3], 1 }
 0x28d   :  { %263 = vsyncpa [#allocation5], 1 }

</bundles_post_ra>
